<compile_context>
chip_gen: v5e
topology: v5e:2x2
jax: 0.10.0
libtpu: 0.0.40
codegen_flags: <defaults>
</compile_context>

<pallas_src>
import functools

import jax
import jax.numpy as jnp
from jax.experimental import pallas as pl
from jax.experimental.pallas import tpu as pltpu


def _round_up(n, m):
    return ((n + m - 1) // m) * m


def _choose_tb(B):
    """Batch-tile size: single tile for small B, >=4 pipelined steps for large B."""
    target = _round_up(pl.cdiv(B, 4), 8)
    target = min(max(target, 512), 2048)
    return min(_round_up(B, 8), target)


def nnmi_kernel(x_ref, w_ref, b_ref, o_ref):
    # x_ref: (TB, K)   flattened inputs for TB batch elements (K = rows*cols)
    # w_ref: (K, F)    fused conv1*conv2 effective weight (resident across steps)
    # b_ref: (1, F)    fused effective bias
    # o_ref: (TB, F)
    acc = jnp.dot(x_ref[...], w_ref[...], preferred_element_type=jnp.float32)
    o_ref[...] = jnp.maximum(acc + b_ref[...], 0.0).astype(o_ref.dtype)


@functools.partial(jax.jit, static_argnames=("tb",))
def nnmi_forward(x, w1, b1, w2, b2, *, tb=None):
    """Forward pass of NNMI.

    x : (B, rows, cols) f32
    w1: (F, cols)  conv1 weight (squeezed from (F, 1, 1, cols))
    b1: (F,)       conv1 bias
    w2: (F, rows)  conv2 depthwise weight (squeezed from (F, 1, rows, 1))
    b2: (F,)       conv2 bias
    returns (B, F) f32, or (F,) when B == 1 (matching PyTorch .squeeze()).
    """
    B, rows, cols = x.shape
    F = w1.shape[0]
    K = rows * cols

    # --- Algebraic fusion of conv1 + depthwise conv2 into one GEMM ---
    w_eff = (w2[:, :, None] * w1[:, None, :]).reshape(F, K).T       # (K, F)
    b_eff = (b1 * jnp.sum(w2, axis=1) + b2).reshape(1, F)           # (1, F)

    x_flat = x.reshape(B, K)

    # --- Batch tiling (no host-side padding; Pallas handles the ragged tail) ---
    if tb is None:
        tb = _choose_tb(B)
    else:
        tb = max(8, _round_up(int(tb), 8))   # keep the (8,128) block rule satisfied

    grid = (pl.cdiv(B, tb),)

    cost = pl.CostEstimate(
        flops=2 * B * K * F,
        transcendentals=0,
        bytes_accessed=B * K * 4 + K * F * 4 + B * F * 4,
    )

    out = pl.pallas_call(
        nnmi_kernel,
        out_shape=jax.ShapeDtypeStruct((B, F), jnp.float32),
        grid=grid,
        in_specs=[
            pl.BlockSpec((tb, K), lambda i: (i, 0)),   # x tile (streams over batch)
            pl.BlockSpec((K, F), lambda i: (0, 0)),    # fused weight (resident)
            pl.BlockSpec((1, F), lambda i: (0, 0)),    # fused bias  (resident)
        ],
        out_specs=pl.BlockSpec((tb, F), lambda i: (i, 0)),
        compiler_params=pltpu.CompilerParams(
            dimension_semantics=("parallel",)),
        cost_estimate=cost,
    )(x_flat, w_eff, b_eff)

    if B == 1:
        # Match PyTorch .squeeze() for a single-element batch.
        # TODO(synk): .squeeze() would also drop F if F == 1; not replicated here.
        return out[0]
    return out


def nnmi_reference(x, w1, b1, w2, b2):
    # Plain-JAX reference replicating the PyTorch module (unfused).
    y = jnp.einsum("brc,fc->brf", x, w1) + b1[None, None, :]     # conv1 -> (B, rows, F)
    z = jnp.einsum("brf,fr->bf", y, w2) + b2[None, :]            # conv2 (depthwise over rows)
    return jnp.maximum(z, 0.0)


if __name__ == "__main__":
    rows, cols = 8, 16
    num_features = 32
    batch = 2

    key = jax.random.PRNGKey(0)
    kx, k1, k2, k3, k4 = jax.random.split(key, 5)

    x = jax.random.normal(kx, (batch, rows, cols), dtype=jnp.float32)
    # Deterministic synthetic parameters (shapes match the nn.Conv2d layers).
    w1 = jax.random.normal(k1, (num_features, cols), dtype=jnp.float32) * 0.1   # conv1.weight (F,1,1,cols)
    b1 = jax.random.normal(k2, (num_features,), dtype=jnp.float32) * 0.1        # conv1.bias
    w2 = jax.random.normal(k3, (num_features, rows), dtype=jnp.float32) * 0.1   # conv2.weight (F,1,rows,1)
    b2 = jax.random.normal(k4, (num_features,), dtype=jnp.float32) * 0.1        # conv2.bias

    out = jax.block_until_ready(nnmi_forward(x, w1, b1, w2, b2))
    ref = nnmi_reference(x, w1, b1, w2, b2)

    assert out.shape == (batch, num_features)
    assert jnp.allclose(out, ref, atol=1e-5, rtol=1e-4), "mismatch vs reference"

    print("KERNEL_OK")
</pallas_src>

<mosaic_0001>
module attributes {stable_mosaic.version = 11 : i64} {
  func.func @nnmi_kernel(%arg0: i32, %arg1: memref<8x128xf32, #tpu.memory_space<vmem>>, %arg2: memref<128x32xf32, #tpu.memory_space<vmem>>, %arg3: memref<1x32xf32, #tpu.memory_space<vmem>>, %arg4: memref<8x32xf32, #tpu.memory_space<vmem>>) attributes {dimension_semantics = [#tpu.dimension_semantics<parallel>], iteration_bounds = array<i64: 1>, scalar_prefetch = 0 : i64, scratch_operands = 0 : i64, tpu.core_type = #tpu.core_type<tc>, window_params = [{transform_indices = @transform_0, window_bounds = array<i64: 8, 128>}, {pipeline_mode = #tpu.pipeline_mode<synchronous>, transform_indices = @transform_1, window_bounds = array<i64: 128, 32>}, {pipeline_mode = #tpu.pipeline_mode<synchronous>, transform_indices = @transform_2, window_bounds = array<i64: 1, 32>}, {transform_indices = @transform_3, window_bounds = array<i64: 8, 32>}]} {
    %c0 = arith.constant 0 : index
    %c0_0 = arith.constant 0 : index
    %0 = vector.load %arg1[%c0, %c0_0] : memref<8x128xf32, #tpu.memory_space<vmem>>, vector<8x128xf32>
    %c0_1 = arith.constant 0 : index
    %c0_2 = arith.constant 0 : index
    %1 = vector.load %arg2[%c0_1, %c0_2] : memref<128x32xf32, #tpu.memory_space<vmem>>, vector<128x32xf32>
    %cst = arith.constant dense<0.000000e+00> : vector<8x32xf32>
    %2 = tpu.matmul %0, %1, %cst {dimension_numbers = #tpu.dot_dimension_numbers<[1], [0], [0], [1], [0, 0, 1, 1], [], []>} : vector<8x128xf32>, vector<128x32xf32>, vector<8x32xf32> -> vector<8x32xf32>
    %c0_3 = arith.constant 0 : index
    %c0_4 = arith.constant 0 : index
    %3 = vector.load %arg3[%c0_3, %c0_4] : memref<1x32xf32, #tpu.memory_space<vmem>>, vector<1x32xf32>
    %4 = vector.broadcast %3 : vector<1x32xf32> to vector<8x32xf32>
    %5 = arith.addf %2, %4 : vector<8x32xf32>
    %cst_5 = arith.constant 0.000000e+00 : f32
    %6 = vector.broadcast %cst_5 : f32 to vector<8x32xf32>
    %7 = arith.maximumf %5, %6 : vector<8x32xf32>
    %c0_6 = arith.constant 0 : index
    %c0_7 = arith.constant 0 : index
    %8 = vector.load %arg4[%c0_6, %c0_7] : memref<8x32xf32, #tpu.memory_space<vmem>>, vector<8x32xf32>
    tpu.vector_store %arg4[%c0_6, %c0_7], %7 {strides = array<i32>} : memref<8x32xf32, #tpu.memory_space<vmem>>, vector<8x32xf32>,
    return
  }
  func.func @transform_0(%arg0: i32) -> (i32, i32) {
    %c0_i32 = arith.constant 0 : i32
    %c0_i32_0 = arith.constant 0 : i32
    return %arg0, %c0_i32 : i32, i32
  }
  func.func @transform_1(%arg0: i32) -> (i32, i32) {
    %c0_i32 = arith.constant 0 : i32
    %c0_i32_0 = arith.constant 0 : i32
    %c0_i32_1 = arith.constant 0 : i32
    return %c0_i32, %c0_i32_0 : i32, i32
  }
  func.func @transform_2(%arg0: i32) -> (i32, i32) {
    %c0_i32 = arith.constant 0 : i32
    %c0_i32_0 = arith.constant 0 : i32
    %c0_i32_1 = arith.constant 0 : i32
    return %c0_i32, %c0_i32_0 : i32, i32
  }
  func.func @transform_3(%arg0: i32) -> (i32, i32) {
    %c0_i32 = arith.constant 0 : i32
    %c0_i32_0 = arith.constant 0 : i32
    return %arg0, %c0_i32 : i32, i32
  }
}

</mosaic_0001>

<bundles_post_ra>
// kernel: nnmi_forward.1
= control target key start
LH: loop header
LB: loop body
LE: loop exit
PB: predicated region body
PF: predicated region fallthrough
CT: control target
= control target key end

     0   :  { %8 = vsyncpa [#allocation3], 0  ;;  %vm57_vm0 = vcmask 261120   ;;  %s187_s0 = inlined_call_operand.vmem [shape: f32[2,128], index: 0, kind: input, shape index: {}]   ;;  %s188_s1 = inlined_call_operand.vmem [shape: f32[128,32], index: 1, kind: input, shape index: {}]   ;;  %s189_s2 = inlined_call_operand.vmem [shape: f32[1,32], index: 2, kind: input, shape index: {}]   ;;  %s190_s3 = inlined_call_operand.hbm [shape: f32[2,32], index: 3, kind: output, shape index: {}]  }
   0x1   :  { %v31_v0 = vld [vmem:[%s188_s1 + $0x78] sm:$0xff]  ;;  %v30_v1 = vld [vmem:[%s188_s1 + $0x70] sm:$0xff]  ;;  %v29_v2 = vld [vmem:[%s188_s1 + $0x68] sm:$0xff] }
   0x2   :  { %36 = vmatpush.msra.mxu0 %v31_v0  ;;  %v28_v3 = vld [vmem:[%s188_s1 + $0x60] sm:$0xff]  ;;  %v27_v4 = vld [vmem:[%s188_s1 + $0x58] sm:$0xff]  ;;  %v26_v5 = vld [vmem:[%s188_s1 + $0x50] sm:$0xff] }
   0x3   :  { %v25_v6 = vld [vmem:[%s188_s1 + $0x48] sm:$0xff]  ;;  %v24_v7 = vld [vmem:[%s188_s1 + $0x40] sm:$0xff]  ;;  %v23_v8 = vld [vmem:[%s188_s1 + $0x38] sm:$0xff] }
   0x4   :  { %37 = vmatpush.msra.mxu0 %v30_v1  ;;  %v22_v9 = vld [vmem:[%s188_s1 + $0x30] sm:$0xff]  ;;  %v21_v10 = vld [vmem:[%s188_s1 + $0x28] sm:$0xff]  ;;  %v20_v11 = vld [vmem:[%s188_s1 + $0x20] sm:$0xff] }
   0x5   :  { %v19_v12 = vld [vmem:[%s188_s1 + $0x18] sm:$0xff]  ;;  %v18_v13 = vld [vmem:[%s188_s1 + $0x10] sm:$0xff]  ;;  %v17_v14 = vld [vmem:[%s188_s1 + $0x8] sm:$0xff] }
   0x6   :  { %38 = vmatpush.msra.mxu0 %v29_v2  ;;  %v16_v15 = vld [vmem:[%s188_s1] sm:$0xff] }
   0x7   :  { %v15_v16 = vld [vmem:[%s187_s0] sm:$0xff] }
   0x8   :  { %39 = vmatpush.msra.mxu0 %v28_v3  ;;  %v80_v17 = vld [vmem:[%s189_s2] ss:$0 sm:$0xff] }
   0xa   :  { %40 = vmatpush.msra.mxu0 %v27_v4 }
   0xc   :  { %41 = vmatpush.msra.mxu0 %v26_v5 }
   0xe   :  { %42 = vmatpush.msra.mxu0 %v25_v6 }
  0x10   :  { %43 = vmatpush.msra.mxu0 %v24_v7 }
  0x12   :  { %44 = vmatpush.msra.mxu0 %v23_v8 }
  0x14   :  { %45 = vmatpush.msra.mxu0 %v22_v9 }
  0x16   :  { %46 = vmatpush.msra.mxu0 %v21_v10 }
  0x18   :  { %47 = vmatpush.msra.mxu0 %v20_v11 }
  0x1a   :  { %48 = vmatpush.msra.mxu0 %v19_v12 }
  0x1c   :  { %49 = vmatpush.msra.mxu0 %v18_v13 }
  0x1e   :  { %50 = vmatpush.msra.mxu0 %v17_v14 }
  0x20   :  { %51 = vmatpush.msra.mxu0 %v16_v15 }
  0x21   :  { %52 = vmatmul.f32.vlgmr.msra.gmra.mxu0 %v15_v16 }
  0x9e   :  { %v53_v18 = vpop.f32.mrf.mxu0 }
  0x9f   :  { %v54_v19 = vadd.f32 %v80_v17, %v53_v18 }
  0xa1   :  { %v56_v20 = vmax.f32 %v54_v19, 0.0 }
  0xa3   :  { %58 = vst.msk [vmem:[#allocation2] sm:$0xff] %vm57_vm0, %v56_v20 }
  0xa4   :  { %62 = vsyncadd [#allocation3], 96  ;;  %s65_s1 = sshll.u32 %s190_s3, 4  ;;  %s107_s23 = smov [#allocation2]   ;;  %s66_s1 = int_to_ptr.hbm [resolvable:$true] %s65_s1 }
  0xa5   :  { %s63_s24 = sshll.u32 %s107_s23, 4  ;;  %s108_s0 = smov 32   ;;  %s64_s24 = int_to_ptr.vmem [resolvable:$true] %s63_s24 }
  0xa6   :  { %s109_s25 = smov 2  }
  0xa7   :  { %71 = dma.vmem_to_hbm [thread:$0]  %s64_s24, 32, %s66_s1, [#allocation3], %s108_s0, %s108_s0, %s109_s25  }
  0xa8   :  { %105 = dma.done.wait [#allocation3], 128  }
  0xa9   :  { %106 = vsyncadd [#allocation3], 4294967168 }
  0xaa   :  { %76 = vsyncpa [#allocation3], 1 }

</bundles_post_ra>
